<compile_context>
chip_gen: v5e
topology: v5e:2x2
jax: 0.10.0
libtpu: 0.0.40
codegen_flags: <defaults>
</compile_context>

<pallas_src>
import functools

import jax
import jax.numpy as jnp
from jax.experimental import pallas as pl
from jax.experimental.pallas import tpu as pltpu

EPS = 1e-5


def _bn_silu_linear(h, w, bn):
    """Linear (bf16 operands / f32 MXU accumulate) -> SiLU -> training-mode BatchNorm1d.

    `bn` is a packed (3, H) f32 block: row 0 = linear bias, row 1 = BN gamma,
    row 2 = BN beta.  Returns the activation in bfloat16 (the next matmul consumes
    bf16 anyway); all statistics / affine math stays in f32.
    """
    bias = bn[0:1]
    gamma = bn[1:2]
    beta = bn[2:3]
    y = jnp.dot(h.astype(w.dtype), w, preferred_element_type=jnp.float32) + bias
    s = y * jax.nn.sigmoid(y)                        # SiLU (logistic -> EUP)
    mu = jnp.mean(s, axis=0, keepdims=True)          # (1, H) batch mean
    d = s - mu
    var = jnp.mean(d * d, axis=0, keepdims=True)     # two-pass biased variance
    scale = gamma * jax.lax.rsqrt(var + EPS)         # fused BN affine: s*scale + shift
    shift = beta - mu * scale
    return (s * scale + shift).astype(jnp.bfloat16)


def _ffnn_fused_kernel(x_ref, w_in_ref, bn_in_ref, w_h_ref, bn_h_ref,
                       w_out_ref, b_out_ref, o_ref, *, num_hidden_layers):
    """Fast path: all weights VMEM-resident, statically unrolled layer loop."""
    h = _bn_silu_linear(x_ref[...], w_in_ref[...], bn_in_ref[...])
    for l in range(num_hidden_layers - 1):           # static L -> fully unrolled
        h = _bn_silu_linear(h, w_h_ref[l], bn_h_ref[l])
    w_out = w_out_ref[...]
    o_ref[...] = (jnp.dot(h.astype(w_out.dtype), w_out,
                          preferred_element_type=jnp.float32)
                  + b_out_ref[...]).astype(o_ref.dtype)


def _ffnn_stream_kernel(x_ref, w_in_ref, bn_in_ref, w_h_ref, bn_h_ref,
                        w_out_ref, b_out_ref, o_ref, h_ref):
    """Streamed path: grid over layers, per-layer weights double-buffered by BlockSpec."""
    l = pl.program_id(0)
    n_layers = pl.num_programs(0)

    @pl.when(l == 0)
    def _():
        h_ref[...] = _bn_silu_linear(x_ref[...], w_in_ref[...], bn_in_ref[...])

    @pl.when(l > 0)
    def _():
        h_ref[...] = _bn_silu_linear(h_ref[...], w_h_ref[0], bn_h_ref[0])

    @pl.when(l == n_layers - 1)
    def _():
        w_out = w_out_ref[...]
        o_ref[...] = (jnp.dot(h_ref[...].astype(w_out.dtype), w_out,
                              preferred_element_type=jnp.float32)
                      + b_out_ref[...]).astype(o_ref.dtype)


def _vmem_limit_bytes():
    cap = 64 * 1024 * 1024                       # conservative fallback (v7x per-TC)
    try:
        cap = int(getattr(pltpu.get_tpu_info(), "vmem_capacity_bytes", cap))
    except Exception:
        pass
    # ~75% of physical: ~96 MiB on v5e/v6e (128 MiB VMEM), ~48 MiB on v7x (64 MiB).
    return int(min(max(32 * 1024 * 1024, (cap * 3) // 4), 112 * 1024 * 1024))


def feedforward_nn_pallas(x, params, num_hidden_layers):
    w_in, bn_in, w_h, bn_h, w_out, b_out = params
    B, In = x.shape
    H = w_in.shape[1]
    Out = w_out.shape[1]
    L = int(num_hidden_layers)
    n_hidden = w_h.shape[0]
    assert L >= 1

    vmem_limit = _vmem_limit_bytes()

    cost = pl.CostEstimate(
        flops=2 * B * (In * H + (L - 1) * H * H + H * Out),
        transcendentals=B * H * L,
        bytes_accessed=int(2 * (In * H + n_hidden * H * H + H * Out)     # bf16 weights
                           + 4 * (B * In + B * Out + 3 * H * (n_hidden + 1) + Out)),
    )

    # VMEM footprint of the all-resident fast path (x2 for input double-buffering,
    # plus some activation working-set headroom).
    fast_bytes = (2 * (2 * (In * H + n_hidden * H * H + H * Out)
                       + 4 * (3 * H * (n_hidden + 1) + Out + B * (In + Out)))
                  + 3 * 4 * B * H)
    use_fast = fast_bytes <= int(0.8 * vmem_limit)

    compiler_params = pltpu.CompilerParams(
        dimension_semantics=("arbitrary",),       # sequential layer chain
        vmem_limit_bytes=vmem_limit,
    )
    out_shape = jax.ShapeDtypeStruct((B, Out), jnp.float32)
    out_spec = pl.BlockSpec((B, Out), lambda l: (0, 0))

    if use_fast:
        # Single grid step; every array is one full VMEM-resident block.
        # (For L == 1 the single dummy hidden-weight slot is still DMA'd; harmless.)
        def full(shape):
            return pl.BlockSpec(shape, lambda l: (0,) * len(shape))

        return pl.pallas_call(
            functools.partial(_ffnn_fused_kernel, num_hidden_layers=L),
            out_shape=out_shape,
            grid_spec=pltpu.PrefetchScalarGridSpec(
                num_scalar_prefetch=0,
                grid=(1,),
                in_specs=[
                    full((B, In)),
                    full((In, H)), full((3, H)),
                    full((n_hidden, H, H)), full((n_hidden, 3, H)),
                    full((H, Out)), full((1, Out)),
                ],
                out_specs=out_spec,
            ),
            compiler_params=compiler_params,
            cost_estimate=cost,
        )(x, w_in, bn_in, w_h, bn_h, w_out, b_out)

    # Streamed path (large H): only ~2 layer-weight tiles VMEM-resident at a time.
    def const_spec(shape):
        # Same block every grid step -> stays VMEM-resident, no re-DMA.
        return pl.BlockSpec(shape, lambda l: (0,) * len(shape))

    def layer_spec(shape):
        # Step l uses layer slot l-1 (clamped at step 0 where it is unused); the
        # auto-pipeline prefetches layer l+1 weights under layer l compute.
        return pl.BlockSpec(
            shape, lambda l: (jnp.maximum(l - 1, 0),) + (0,) * (len(shape) - 1))

    return pl.pallas_call(
        _ffnn_stream_kernel,
        out_shape=out_shape,
        grid_spec=pltpu.PrefetchScalarGridSpec(
            num_scalar_prefetch=0,
            grid=(L,),
            in_specs=[
                const_spec((B, In)),
                const_spec((In, H)), const_spec((3, H)),
                layer_spec((1, H, H)), layer_spec((1, 3, H)),
                const_spec((H, Out)), const_spec((1, Out)),
            ],
            out_specs=out_spec,
            scratch_shapes=[pltpu.VMEM((B, H), jnp.bfloat16)],  # persistent activation
        ),
        compiler_params=compiler_params,
        cost_estimate=cost,
    )(x, w_in, bn_in, w_h, bn_h, w_out, b_out)


def init_params(key, input_size, hidden_size, num_hidden_layers, output_size,
                weight_dtype=jnp.bfloat16):
    """Xavier-uniform weights (bf16, (in, out) layout); packed BN params (bias, gamma, beta)."""
    ks = jax.random.split(key, 3)

    def xavier(k, fan_in, fan_out, shape):
        limit = jnp.sqrt(6.0 / (fan_in + fan_out))
        return jax.random.uniform(k, shape, jnp.float32, -limit, limit).astype(weight_dtype)

    L = num_hidden_layers
    n_hidden = max(L - 1, 1)   # keep >= 1 slot so the stacked refs have a valid shape

    def packed_bn(h):
        # row 0: linear bias (0), row 1: BN gamma (1), row 2: BN beta (0)
        return jnp.stack([jnp.zeros((h,), jnp.float32),
                          jnp.ones((h,), jnp.float32),
                          jnp.zeros((h,), jnp.float32)], axis=0)

    w_in = xavier(ks[0], input_size, hidden_size, (input_size, hidden_size))
    bn_in = packed_bn(hidden_size)
    w_h = xavier(ks[1], hidden_size, hidden_size, (n_hidden, hidden_size, hidden_size))
    bn_h = jnp.tile(packed_bn(hidden_size)[None], (n_hidden, 1, 1))
    w_out = xavier(ks[2], hidden_size, output_size, (hidden_size, output_size))
    b_out = jnp.zeros((1, output_size), jnp.float32)
    return (w_in, bn_in, w_h, bn_h, w_out, b_out)


def reference_jax(x, params, num_hidden_layers):
    """Pure-JAX mirror of the PyTorch forward (training-mode BN), bf16 weights / f32 acc."""
    w_in, bn_in, w_h, bn_h, w_out, b_out = params

    def block(h, w, bn):
        b, g, be = bn[0], bn[1], bn[2]
        y = jnp.dot(h.astype(w.dtype), w, preferred_element_type=jnp.float32) + b
        s = y * jax.nn.sigmoid(y)
        mu = jnp.mean(s, axis=0, keepdims=True)
        var = jnp.mean((s - mu) ** 2, axis=0, keepdims=True)   # biased (PyTorch training BN)
        return (s - mu) * jax.lax.rsqrt(var + EPS) * g + be

    h = block(x, w_in, bn_in)
    for l in range(num_hidden_layers - 1):
        h = block(h, w_h[l], bn_h[l])
    return jnp.dot(h.astype(w_out.dtype), w_out,
                   preferred_element_type=jnp.float32) + b_out


if __name__ == "__main__":
    # Small shapes consistent with the module's forward: x is (batch, input_size).
    # batch a multiple of 8 sublanes (16 for bf16-packed matmul inputs); hidden lane-dense.
    batch = 16
    input_size = 16
    hidden_size = 128
    num_hidden_layers = 3
    output_size = 8

    key = jax.random.PRNGKey(0)
    kx, kp = jax.random.split(key)
    x = jax.random.normal(kx, (batch, input_size), jnp.float32)
    params = init_params(kp, input_size, hidden_size, num_hidden_layers, output_size)

    out = jax.block_until_ready(feedforward_nn_pallas(x, params, num_hidden_layers))
    ref = reference_jax(x, params, num_hidden_layers)

    assert out.shape == (batch, output_size)
    # bf16 weights/activations feed the MXU with f32 accumulation in both kernel and
    # reference -> modest tolerance.
    assert jnp.allclose(out, ref, atol=5e-3, rtol=5e-3), \
        float(jnp.max(jnp.abs(out - ref)))

    print("KERNEL_OK")
</pallas_src>

<mosaic_0001>
module attributes {stable_mosaic.version = 11 : i64} {
  func.func @_ffnn_fused_kernel(%arg0: i32, %arg1: memref<16x16xf32, #tpu.memory_space<vmem>>, %arg2: memref<16x128xbf16, #tpu.memory_space<vmem>>, %arg3: memref<3x128xf32, #tpu.memory_space<vmem>>, %arg4: memref<2x128x128xbf16, #tpu.memory_space<vmem>>, %arg5: memref<2x3x128xf32, #tpu.memory_space<vmem>>, %arg6: memref<128x8xbf16, #tpu.memory_space<vmem>>, %arg7: memref<1x8xf32, #tpu.memory_space<vmem>>, %arg8: memref<16x8xf32, #tpu.memory_space<vmem>>) attributes {dimension_semantics = [#tpu.dimension_semantics<arbitrary>], iteration_bounds = array<i64: 1>, scalar_prefetch = 0 : i64, scratch_operands = 0 : i64, tpu.core_type = #tpu.core_type<tc>, window_params = [{pipeline_mode = #tpu.pipeline_mode<synchronous>, transform_indices = @transform_0, window_bounds = array<i64: 16, 16>}, {pipeline_mode = #tpu.pipeline_mode<synchronous>, transform_indices = @transform_1, window_bounds = array<i64: 16, 128>}, {pipeline_mode = #tpu.pipeline_mode<synchronous>, transform_indices = @transform_2, window_bounds = array<i64: 3, 128>}, {pipeline_mode = #tpu.pipeline_mode<synchronous>, transform_indices = @transform_3, window_bounds = array<i64: 2, 128, 128>}, {pipeline_mode = #tpu.pipeline_mode<synchronous>, transform_indices = @transform_4, window_bounds = array<i64: 2, 3, 128>}, {pipeline_mode = #tpu.pipeline_mode<synchronous>, transform_indices = @transform_5, window_bounds = array<i64: 128, 8>}, {pipeline_mode = #tpu.pipeline_mode<synchronous>, transform_indices = @transform_6, window_bounds = array<i64: 1, 8>}, {pipeline_mode = #tpu.pipeline_mode<synchronous>, transform_indices = @transform_7, window_bounds = array<i64: 16, 8>}]} {
    %c0 = arith.constant 0 : index
    %c0_0 = arith.constant 0 : index
    %0 = vector.load %arg1[%c0, %c0_0] : memref<16x16xf32, #tpu.memory_space<vmem>>, vector<16x16xf32>
    %c0_1 = arith.constant 0 : index
    %c0_2 = arith.constant 0 : index
    %1 = vector.load %arg2[%c0_1, %c0_2] : memref<16x128xbf16, #tpu.memory_space<vmem>>, vector<16x128xbf16>
    %c0_3 = arith.constant 0 : index
    %c0_4 = arith.constant 0 : index
    %2 = vector.load %arg3[%c0_3, %c0_4] : memref<3x128xf32, #tpu.memory_space<vmem>>, vector<3x128xf32>
    %3 = vector.extract_strided_slice %2 {offsets = [0, 0], sizes = [1, 128], strides = [1, 1]} : vector<3x128xf32> to vector<1x128xf32>
    %4 = vector.extract_strided_slice %2 {offsets = [1, 0], sizes = [1, 128], strides = [1, 1]} : vector<3x128xf32> to vector<1x128xf32>
    %5 = vector.extract_strided_slice %2 {offsets = [2, 0], sizes = [1, 128], strides = [1, 1]} : vector<3x128xf32> to vector<1x128xf32>
    %6 = arith.truncf %0 : vector<16x16xf32> to vector<16x16xbf16>
    %cst = arith.constant dense<0.000000e+00> : vector<16x128xf32>
    %7 = tpu.matmul %6, %1, %cst {dimension_numbers = #tpu.dot_dimension_numbers<[1], [0], [0], [1], [0, 0, 1, 1], [], []>} : vector<16x16xbf16>, vector<16x128xbf16>, vector<16x128xf32> -> vector<16x128xf32>
    %8 = vector.broadcast %3 : vector<1x128xf32> to vector<16x128xf32>
    %9 = arith.addf %7, %8 : vector<16x128xf32>
    %10 = arith.negf %9 : vector<16x128xf32>
    %11 = math.exp %10 : vector<16x128xf32>
    %cst_5 = arith.constant 1.000000e+00 : f32
    %12 = vector.broadcast %cst_5 : f32 to vector<16x128xf32>
    %13 = arith.addf %12, %11 : vector<16x128xf32>
    %14 = arith.divf %12, %13 : vector<16x128xf32>
    %15 = arith.mulf %9, %14 : vector<16x128xf32>
    %cst_6 = arith.constant dense<0.000000e+00> : vector<128xf32>
    %16 = vector.multi_reduction <add>, %15, %cst_6 [0] : vector<16x128xf32> to vector<128xf32>
    %17 = vector.shape_cast %16 : vector<128xf32> to vector<1x128xf32>
    %cst_7 = arith.constant 1.600000e+01 : f32
    %18 = vector.broadcast %cst_7 : f32 to vector<1x128xf32>
    %19 = arith.divf %17, %18 : vector<1x128xf32>
    %20 = vector.broadcast %19 : vector<1x128xf32> to vector<16x128xf32>
    %21 = arith.subf %15, %20 : vector<16x128xf32>
    %22 = arith.mulf %21, %21 : vector<16x128xf32>
    %cst_8 = arith.constant dense<0.000000e+00> : vector<128xf32>
    %23 = vector.multi_reduction <add>, %22, %cst_8 [0] : vector<16x128xf32> to vector<128xf32>
    %24 = vector.shape_cast %23 : vector<128xf32> to vector<1x128xf32>
    %cst_9 = arith.constant 1.600000e+01 : f32
    %25 = vector.broadcast %cst_9 : f32 to vector<1x128xf32>
    %26 = arith.divf %24, %25 : vector<1x128xf32>
    %cst_10 = arith.constant 9.99999974E-6 : f32
    %27 = vector.broadcast %cst_10 : f32 to vector<1x128xf32>
    %28 = arith.addf %26, %27 : vector<1x128xf32>
    %29 = math.rsqrt %28 : vector<1x128xf32>
    %30 = arith.mulf %4, %29 : vector<1x128xf32>
    %31 = arith.mulf %19, %30 : vector<1x128xf32>
    %32 = arith.subf %5, %31 : vector<1x128xf32>
    %33 = vector.broadcast %30 : vector<1x128xf32> to vector<16x128xf32>
    %34 = arith.mulf %15, %33 : vector<16x128xf32>
    %35 = vector.broadcast %32 : vector<1x128xf32> to vector<16x128xf32>
    %36 = arith.addf %34, %35 : vector<16x128xf32>
    %37 = arith.truncf %36 : vector<16x128xf32> to vector<16x128xbf16>
    %c0_11 = arith.constant 0 : index
    %c0_12 = arith.constant 0 : index
    %c0_13 = arith.constant 0 : index
    %38 = vector.load %arg4[%c0_11, %c0_12, %c0_13] : memref<2x128x128xbf16, #tpu.memory_space<vmem>>, vector<1x128x128xbf16>
    %39 = vector.shape_cast %38 : vector<1x128x128xbf16> to vector<128x128xbf16>
    %c0_14 = arith.constant 0 : index
    %c0_15 = arith.constant 0 : index
    %c0_16 = arith.constant 0 : index
    %40 = vector.load %arg5[%c0_14, %c0_15, %c0_16] : memref<2x3x128xf32, #tpu.memory_space<vmem>>, vector<1x3x128xf32>
    %41 = vector.shape_cast %40 : vector<1x3x128xf32> to vector<3x128xf32>
    %42 = vector.extract_strided_slice %41 {offsets = [0, 0], sizes = [1, 128], strides = [1, 1]} : vector<3x128xf32> to vector<1x128xf32>
    %43 = vector.extract_strided_slice %41 {offsets = [1, 0], sizes = [1, 128], strides = [1, 1]} : vector<3x128xf32> to vector<1x128xf32>
    %44 = vector.extract_strided_slice %41 {offsets = [2, 0], sizes = [1, 128], strides = [1, 1]} : vector<3x128xf32> to vector<1x128xf32>
    %cst_17 = arith.constant dense<0.000000e+00> : vector<16x128xf32>
    %45 = tpu.matmul %37, %39, %cst_17 {dimension_numbers = #tpu.dot_dimension_numbers<[1], [0], [0], [1], [0, 0, 1, 1], [], []>} : vector<16x128xbf16>, vector<128x128xbf16>, vector<16x128xf32> -> vector<16x128xf32>
    %46 = vector.broadcast %42 : vector<1x128xf32> to vector<16x128xf32>
    %47 = arith.addf %45, %46 : vector<16x128xf32>
    %48 = arith.negf %47 : vector<16x128xf32>
    %49 = math.exp %48 : vector<16x128xf32>
    %cst_18 = arith.constant 1.000000e+00 : f32
    %50 = vector.broadcast %cst_18 : f32 to vector<16x128xf32>
    %51 = arith.addf %50, %49 : vector<16x128xf32>
    %52 = arith.divf %50, %51 : vector<16x128xf32>
    %53 = arith.mulf %47, %52 : vector<16x128xf32>
    %cst_19 = arith.constant dense<0.000000e+00> : vector<128xf32>
    %54 = vector.multi_reduction <add>, %53, %cst_19 [0] : vector<16x128xf32> to vector<128xf32>
    %55 = vector.shape_cast %54 : vector<128xf32> to vector<1x128xf32>
    %cst_20 = arith.constant 1.600000e+01 : f32
    %56 = vector.broadcast %cst_20 : f32 to vector<1x128xf32>
    %57 = arith.divf %55, %56 : vector<1x128xf32>
    %58 = vector.broadcast %57 : vector<1x128xf32> to vector<16x128xf32>
    %59 = arith.subf %53, %58 : vector<16x128xf32>
    %60 = arith.mulf %59, %59 : vector<16x128xf32>
    %cst_21 = arith.constant dense<0.000000e+00> : vector<128xf32>
    %61 = vector.multi_reduction <add>, %60, %cst_21 [0] : vector<16x128xf32> to vector<128xf32>
    %62 = vector.shape_cast %61 : vector<128xf32> to vector<1x128xf32>
    %cst_22 = arith.constant 1.600000e+01 : f32
    %63 = vector.broadcast %cst_22 : f32 to vector<1x128xf32>
    %64 = arith.divf %62, %63 : vector<1x128xf32>
    %cst_23 = arith.constant 9.99999974E-6 : f32
    %65 = vector.broadcast %cst_23 : f32 to vector<1x128xf32>
    %66 = arith.addf %64, %65 : vector<1x128xf32>
    %67 = math.rsqrt %66 : vector<1x128xf32>
    %68 = arith.mulf %43, %67 : vector<1x128xf32>
    %69 = arith.mulf %57, %68 : vector<1x128xf32>
    %70 = arith.subf %44, %69 : vector<1x128xf32>
    %71 = vector.broadcast %68 : vector<1x128xf32> to vector<16x128xf32>
    %72 = arith.mulf %53, %71 : vector<16x128xf32>
    %73 = vector.broadcast %70 : vector<1x128xf32> to vector<16x128xf32>
    %74 = arith.addf %72, %73 : vector<16x128xf32>
    %75 = arith.truncf %74 : vector<16x128xf32> to vector<16x128xbf16>
    %c1 = arith.constant 1 : index
    %c0_24 = arith.constant 0 : index
    %c0_25 = arith.constant 0 : index
    %76 = vector.load %arg4[%c1, %c0_24, %c0_25] : memref<2x128x128xbf16, #tpu.memory_space<vmem>>, vector<1x128x128xbf16>
    %77 = vector.shape_cast %76 : vector<1x128x128xbf16> to vector<128x128xbf16>
    %c1_26 = arith.constant 1 : index
    %c0_27 = arith.constant 0 : index
    %c0_28 = arith.constant 0 : index
    %78 = vector.load %arg5[%c1_26, %c0_27, %c0_28] : memref<2x3x128xf32, #tpu.memory_space<vmem>>, vector<1x3x128xf32>
    %79 = vector.shape_cast %78 : vector<1x3x128xf32> to vector<3x128xf32>
    %80 = vector.extract_strided_slice %79 {offsets = [0, 0], sizes = [1, 128], strides = [1, 1]} : vector<3x128xf32> to vector<1x128xf32>
    %81 = vector.extract_strided_slice %79 {offsets = [1, 0], sizes = [1, 128], strides = [1, 1]} : vector<3x128xf32> to vector<1x128xf32>
    %82 = vector.extract_strided_slice %79 {offsets = [2, 0], sizes = [1, 128], strides = [1, 1]} : vector<3x128xf32> to vector<1x128xf32>
    %cst_29 = arith.constant dense<0.000000e+00> : vector<16x128xf32>
    %83 = tpu.matmul %75, %77, %cst_29 {dimension_numbers = #tpu.dot_dimension_numbers<[1], [0], [0], [1], [0, 0, 1, 1], [], []>} : vector<16x128xbf16>, vector<128x128xbf16>, vector<16x128xf32> -> vector<16x128xf32>
    %84 = vector.broadcast %80 : vector<1x128xf32> to vector<16x128xf32>
    %85 = arith.addf %83, %84 : vector<16x128xf32>
    %86 = arith.negf %85 : vector<16x128xf32>
    %87 = math.exp %86 : vector<16x128xf32>
    %cst_30 = arith.constant 1.000000e+00 : f32
    %88 = vector.broadcast %cst_30 : f32 to vector<16x128xf32>
    %89 = arith.addf %88, %87 : vector<16x128xf32>
    %90 = arith.divf %88, %89 : vector<16x128xf32>
    %91 = arith.mulf %85, %90 : vector<16x128xf32>
    %cst_31 = arith.constant dense<0.000000e+00> : vector<128xf32>
    %92 = vector.multi_reduction <add>, %91, %cst_31 [0] : vector<16x128xf32> to vector<128xf32>
    %93 = vector.shape_cast %92 : vector<128xf32> to vector<1x128xf32>
    %cst_32 = arith.constant 1.600000e+01 : f32
    %94 = vector.broadcast %cst_32 : f32 to vector<1x128xf32>
    %95 = arith.divf %93, %94 : vector<1x128xf32>
    %96 = vector.broadcast %95 : vector<1x128xf32> to vector<16x128xf32>
    %97 = arith.subf %91, %96 : vector<16x128xf32>
    %98 = arith.mulf %97, %97 : vector<16x128xf32>
    %cst_33 = arith.constant dense<0.000000e+00> : vector<128xf32>
    %99 = vector.multi_reduction <add>, %98, %cst_33 [0] : vector<16x128xf32> to vector<128xf32>
    %100 = vector.shape_cast %99 : vector<128xf32> to vector<1x128xf32>
    %cst_34 = arith.constant 1.600000e+01 : f32
    %101 = vector.broadcast %cst_34 : f32 to vector<1x128xf32>
    %102 = arith.divf %100, %101 : vector<1x128xf32>
    %cst_35 = arith.constant 9.99999974E-6 : f32
    %103 = vector.broadcast %cst_35 : f32 to vector<1x128xf32>
    %104 = arith.addf %102, %103 : vector<1x128xf32>
    %105 = math.rsqrt %104 : vector<1x128xf32>
    %106 = arith.mulf %81, %105 : vector<1x128xf32>
    %107 = arith.mulf %95, %106 : vector<1x128xf32>
    %108 = arith.subf %82, %107 : vector<1x128xf32>
    %109 = vector.broadcast %106 : vector<1x128xf32> to vector<16x128xf32>
    %110 = arith.mulf %91, %109 : vector<16x128xf32>
    %111 = vector.broadcast %108 : vector<1x128xf32> to vector<16x128xf32>
    %112 = arith.addf %110, %111 : vector<16x128xf32>
    %113 = arith.truncf %112 : vector<16x128xf32> to vector<16x128xbf16>
    %c0_36 = arith.constant 0 : index
    %c0_37 = arith.constant 0 : index
    %114 = vector.load %arg6[%c0_36, %c0_37] : memref<128x8xbf16, #tpu.memory_space<vmem>>, vector<128x8xbf16>
    %cst_38 = arith.constant dense<0.000000e+00> : vector<16x8xf32>
    %115 = tpu.matmul %113, %114, %cst_38 {dimension_numbers = #tpu.dot_dimension_numbers<[1], [0], [0], [1], [0, 0, 1, 1], [], []>} : vector<16x128xbf16>, vector<128x8xbf16>, vector<16x8xf32> -> vector<16x8xf32>
    %c0_39 = arith.constant 0 : index
    %c0_40 = arith.constant 0 : index
    %116 = vector.load %arg7[%c0_39, %c0_40] : memref<1x8xf32, #tpu.memory_space<vmem>>, vector<1x8xf32>
    %117 = vector.broadcast %116 : vector<1x8xf32> to vector<16x8xf32>
    %118 = arith.addf %115, %117 : vector<16x8xf32>
    %c0_41 = arith.constant 0 : index
    %c0_42 = arith.constant 0 : index
    %119 = vector.load %arg8[%c0_41, %c0_42] : memref<16x8xf32, #tpu.memory_space<vmem>>, vector<16x8xf32>
    tpu.vector_store %arg8[%c0_41, %c0_42], %118 {strides = array<i32>} : memref<16x8xf32, #tpu.memory_space<vmem>>, vector<16x8xf32>,
    return
  }
  func.func @transform_0(%arg0: i32) -> (i32, i32) {
    %c0_i32 = arith.constant 0 : i32
    %c0_i32_0 = arith.constant 0 : i32
    %c0_i32_1 = arith.constant 0 : i32
    return %c0_i32, %c0_i32_0 : i32, i32
  }
  func.func @transform_1(%arg0: i32) -> (i32, i32) {
    %c0_i32 = arith.constant 0 : i32
    %c0_i32_0 = arith.constant 0 : i32
    %c0_i32_1 = arith.constant 0 : i32
    return %c0_i32, %c0_i32_0 : i32, i32
  }
  func.func @transform_2(%arg0: i32) -> (i32, i32) {
    %c0_i32 = arith.constant 0 : i32
    %c0_i32_0 = arith.constant 0 : i32
    %c0_i32_1 = arith.constant 0 : i32
    return %c0_i32, %c0_i32_0 : i32, i32
  }
  func.func @transform_3(%arg0: i32) -> (i32, i32, i32) {
    %c0_i32 = arith.constant 0 : i32
    %c0_i32_0 = arith.constant 0 : i32
    %c0_i32_1 = arith.constant 0 : i32
    %c0_i32_2 = arith.constant 0 : i32
    return %c0_i32, %c0_i32_0, %c0_i32_1 : i32, i32, i32
  }
  func.func @transform_4(%arg0: i32) -> (i32, i32, i32) {
    %c0_i32 = arith.constant 0 : i32
    %c0_i32_0 = arith.constant 0 : i32
    %c0_i32_1 = arith.constant 0 : i32
    %c0_i32_2 = arith.constant 0 : i32
    return %c0_i32, %c0_i32_0, %c0_i32_1 : i32, i32, i32
  }
  func.func @transform_5(%arg0: i32) -> (i32, i32) {
    %c0_i32 = arith.constant 0 : i32
    %c0_i32_0 = arith.constant 0 : i32
    %c0_i32_1 = arith.constant 0 : i32
    return %c0_i32, %c0_i32_0 : i32, i32
  }
  func.func @transform_6(%arg0: i32) -> (i32, i32) {
    %c0_i32 = arith.constant 0 : i32
    %c0_i32_0 = arith.constant 0 : i32
    %c0_i32_1 = arith.constant 0 : i32
    return %c0_i32, %c0_i32_0 : i32, i32
  }
  func.func @transform_7(%arg0: i32) -> (i32, i32) {
    %c0_i32 = arith.constant 0 : i32
    %c0_i32_0 = arith.constant 0 : i32
    %c0_i32_1 = arith.constant 0 : i32
    return %c0_i32, %c0_i32_0 : i32, i32
  }
}

</mosaic_0001>

<bundles_post_ra>
// kernel: tpu_custom_call.1
= control target key start
LH: loop header
LB: loop body
LE: loop exit
PB: predicated region body
PF: predicated region fallthrough
CT: control target
= control target key end

     0   :  { %12 = vsyncpa [#allocation3], 0  ;;  %s781_s27 = smov [#allocation2]   ;;  %s782_s29 = smov 64   ;;  %s902_s0 = inlined_call_operand.vmem [shape: f32[16,16], index: 0, kind: input, shape index: {}]   ;;  %s903_s1 = inlined_call_operand.vmem [shape: bf16[16,128], index: 1, kind: input, shape index: {}]   ;;  %s904_s2 = inlined_call_operand.vmem [shape: f32[3,128], index: 2, kind: input, shape index: {}]   ;;  %s905_s3 = inlined_call_operand.hbm [shape: bf16[2,128,128], index: 3, kind: input, shape index: {}]   ;;  %s906_s4 = inlined_call_operand.vmem [shape: f32[2,3,128], index: 4, kind: input, shape index: {}]   ;;  %s907_s5 = inlined_call_operand.vmem [shape: bf16[128,8], index: 5, kind: input, shape index: {}]   ;;  %s908_s6 = inlined_call_operand.vmem [shape: f32[1,8], index: 6, kind: input, shape index: {}]   ;;  %s909_s7 = inlined_call_operand.vmem [shape: f32[16,8], index: 7, kind: output, shape index: {}]  }
   0x1   :  { %s23_s26 = sshll.u32 %s905_s3, 4  ;;  %s25_s28 = sshll.u32 %s781_s27, 4  ;;  %s24_s26 = int_to_ptr.hbm [resolvable:$true] %s23_s26  ;;  %s26_s28 = int_to_ptr.vmem [resolvable:$true] %s25_s28 }
   0x2   :  { %s783_s30 = smov 4  }
   0x3   :  { %31 = dma.hbm_to_vmem [thread:$0]  %s24_s26, 2048, %s26_s28, [#allocation3], %s782_s29, %s782_s29, %s783_s30  }
   0x4   :  { %779 = dma.done.wait [#allocation3], 2048  }
   0x5   :  { %780 = vsyncadd [#allocation3], 4294965248  ;;  %v693_v0 = vld [vmem:[%s903_s1] sm:$0xff]  ;;  %v44_v2 = vld [vmem:[%s902_s0 + $0x8] sm:$0xff]  ;;  %vm56_vm0 = vcmask 130048   ;;  %v784_v20 = vmov 16.0  }
   0x6   :  { %v43_v1 = vld [vmem:[%s902_s0] sm:$0xff]  ;;  %67 = vmatpush.bf16.msra.mxu0 %v693_v0  ;;  %v701_v46 = vld [vmem:[#allocation2 + $0x38] sm:$0xff]  ;;  %v700_v49 = vld [vmem:[#allocation2 + $0x30] sm:$0xff] }
   0x7   :  { %v48_v3 = vpack.c.bf16 %v44_v2, %v43_v1  ;;  %v840_v4 = vld [vmem:[%s904_s2] sm:$0x7]  ;;  %231 = vmatpush.bf16.msra.mxu1 %v701_v46  ;;  %v699_v53 = vld [vmem:[#allocation2 + $0x28] sm:$0xff]  ;;  %v697_v61 = vld [vmem:[#allocation2 + $0x18] sm:$0xff] }
   0x8   :  { %v49_v5 = vperm.slane %v840_v4, 0  ;;  %v698_v56 = vld [vmem:[#allocation2 + $0x20] sm:$0xff]  ;;  %v696_v0 = vld [vmem:[#allocation2 + $0x10] sm:$0xff] }
   0x9   :  { %589 = vmatmul.msk.bf16.vlgmr.msra.gmra.mxu0 %vm56_vm0, %v48_v3  ;;  %v695_v3 = vld [vmem:[#allocation2 + $0x8] sm:$0xff] }
   0xb   :  { %232 = vmatpush.bf16.msra.mxu1 %v700_v49 }
   0xf   :  { %233 = vmatpush.bf16.msra.mxu1 %v699_v53 }
  0x13   :  { %234 = vmatpush.bf16.msra.mxu1 %v698_v56 }
  0x17   :  { %235 = vmatpush.bf16.msra.mxu1 %v697_v61 }
  0x1b   :  { %236 = vmatpush.bf16.msra.mxu1 %v696_v0 }
  0x1f   :  { %237 = vmatpush.bf16.msra.mxu1 %v695_v3 }
  0x86   :  { %v69_v6 = vpop.f32.mrf.mxu0 }
  0x87   :  { %v70_v7 = vadd.f32 %v69_v6, %v49_v5 }
  0x89   :  { %v590_v8 = vmul.f32 -1.442695, %v70_v7 }
  0x8b   :  { %723 = vpow2.f32 %v590_v8 }
  0x8e   :  { %v71_v9 = vpop.f32.mrf.mxu0 }
  0x8f   :  { %v72_v10 = vadd.f32 %v71_v9, %v49_v5 }
  0x91   :  { %v724_v11 = vpop.eup %723  ;;  %v591_v12 = vmul.f32 -1.442695, %v72_v10 }
  0x92   :  { %v80_v13 = vadd.f32 1.0, %v724_v11 }
  0x93   :  { %725 = vpow2.f32 %v591_v12 }
  0x94   :  { %727 = vrcp.f32 %v80_v13  ;;  %v93_v24 = vand.u32 2147483648, %v80_v13  ;;  %vm87_vm2 = vweird.f32 %v80_v13  ;;  %v91_v25 = vand.u32 2147483647, %v80_v13 }
  0x96   :  { %v94_v32 = vor.u32 1.1754944e-38, %v93_v24  ;;  %vm92_vm5 = vcmp.eq.f32.partialorder %v91_v25, 8.507059e+37 }
  0x99   :  { %v726_v14 = vpop.eup %725 }
  0x9a   :  { %v728_v15 = vpop.eup %727  ;;  %v81_v16 = vadd.f32 1.0, %v726_v14 }
  0x9b   :  { %v83_v17 = vmul.f32 %v728_v15, %v80_v13  ;;  %vm88_vm1 = vweird.f32 %v728_v15 }
  0x9c   :  { %729 = vrcp.f32 %v81_v16  ;;  %vm89_vm3 = vmor %vm87_vm2, %vm88_vm1  ;;  %v108_v27 = vand.u32 2147483648, %v81_v16  ;;  %v106_v31 = vand.u32 2147483647, %v81_v16  ;;  %vm102_vm6 = vweird.f32 %v81_v16 }
  0x9d   :  { %v84_v18 = vsub.f32 1.0, %v83_v17  ;;  %731 = vrcp.f32 %v784_v20 }
  0x9e   :  { %v109_v35 = vor.u32 1.1754944e-38, %v108_v27  ;;  %vm107_vm8 = vcmp.eq.f32.partialorder %v106_v31, 8.507059e+37 }
  0x9f   :  { %v85_v19 = vmul.f32 %v728_v15, %v84_v18 }
  0xa1   :  { %v86_v22 = vadd.f32 %v728_v15, %v85_v19 }
  0xa2   :  { %v730_v21 = vpop.eup %729 }
  0xa3   :  { %v98_v23 = vmul.f32 %v730_v21, %v81_v16  ;;  %v732_v28 = vpop.eup %731  ;;  %v90_v29 = vsel %vm89_vm3, %v728_v15, %v86_v22  ;;  %vm103_vm4 = vweird.f32 %v730_v21 }
  0xa4   :  { %v95_v34 = vsel %vm92_vm5, %v94_v32, %v90_v29  ;;  %vm104_vm7 = vmor %vm102_vm6, %vm103_vm4  ;;  %v122_v36 = vmul.f32 16.0, %v732_v28  ;;  %vm126_vm9 = vweird.f32 %v732_v28  ;;  %v852_v29 = vld [vmem:[%s906_s4] sm:$0x7] }
  0xa5   :  { %v99_v26 = vsub.f32 1.0, %v98_v23  ;;  %v112_v39 = vmul.f32 %v95_v34, %v70_v7  ;;  %v694_v7 = vld [vmem:[#allocation2] sm:$0xff] }
  0xa6   :  { %v123_v41 = vsub.f32 1.0, %v122_v36  ;;  %238 = vmatpush.bf16.msra.mxu1 %v694_v7 }
  0xa7   :  { %v100_v30 = vmul.f32 %v730_v21, %v99_v26 }
  0xa8   :  { %v124_v44 = vmul.f32 %v732_v28, %v123_v41 }
  0xa9   :  { %v101_v33 = vadd.f32 %v730_v21, %v100_v30  ;;  %v182_v30 = vperm.slane %v852_v29, 0 }
  0xaa   :  { %v125_v48 = vadd.f32 %v732_v28, %v124_v44 }
  0xab   :  { %v105_v37 = vsel %vm104_vm7, %v730_v21, %v101_v33 }
  0xac   :  { %v110_v38 = vsel %vm107_vm8, %v109_v35, %v105_v37  ;;  %v843_v52 = vsel %vm126_vm9, %v732_v28, %v125_v48 }
  0xad   :  { %v113_v40 = vmul.f32 %v110_v38, %v72_v10 }
  0xaf   :  { %v114_v42 = vadd.f32 %v113_v40, %v112_v39 }
  0xb1   :  { %v115_v43 = vrot.slane %v114_v42, 4 }
  0xb3   :  { %v116_v45 = vadd.f32 %v115_v43, %v114_v42 }
  0xb5   :  { %v117_v47 = vrot.slane %v116_v45, 2 }
  0xb7   :  { %v118_v50 = vadd.f32 %v117_v47, %v116_v45 }
  0xb9   :  { %v119_v51 = vrot.slane %v118_v50, 1 }
  0xbb   :  { %v120_v54 = vadd.f32 %v119_v51, %v118_v50 }
  0xbd   :  { %v128_v55 = vmul.f32 %v843_v52, %v120_v54 }
  0xbf   :  { %v129_v57 = vsub.f32 %v112_v39, %v128_v55  ;;  %v130_v58 = vsub.f32 %v113_v40, %v128_v55 }
  0xc1   :  { %v131_v59 = vmul.f32 %v129_v57, %v129_v57  ;;  %v132_v60 = vmul.f32 %v130_v58, %v130_v58 }
  0xc3   :  { %v133_v62 = vadd.f32 %v132_v60, %v131_v59 }
  0xc5   :  { %v134_v63 = vrot.slane %v133_v62, 4 }
  0xc7   :  { %v135_v1 = vadd.f32 %v134_v63, %v133_v62 }
  0xc9   :  { %v136_v2 = vrot.slane %v135_v1, 2 }
  0xcb   :  { %v137_v5 = vadd.f32 %v136_v2, %v135_v1  ;;  %v709_v2 = vld [vmem:[#allocation2 + $0x78] sm:$0xff] }
  0xcc   :  { %397 = vmatpush.bf16.msra.mxu2 %v709_v2 }
  0xcd   :  { %v138_v6 = vrot.slane %v137_v5, 1 }
  0xcf   :  { %v139_v8 = vadd.f32 %v138_v6, %v137_v5  ;;  %v708_v5 = vld [vmem:[#allocation2 + $0x70] sm:$0xff] }
  0xd0   :  { %398 = vmatpush.bf16.msra.mxu2 %v708_v5 }
  0xd1   :  { %v140_v9 = vmul.f32 %v139_v8, %v843_v52  ;;  %v707_v8 = vld [vmem:[#allocation2 + $0x68] sm:$0xff] }
  0xd3   :  { %v141_v10 = vadd.f32 1e-05, %v140_v9 }
  0xd4   :  { %399 = vmatpush.bf16.msra.mxu2 %v707_v8 }
  0xd5   :  { %733 = vrsqrt.f32 %v141_v10  ;;  %vm148_vm11 = vweird.f32 %v141_v10 }
  0xdb   :  { %v734_v11 = vpop.eup %733 }
  0xdc   :  { %v143_v12 = vmul.f32 %v734_v11, %v141_v10  ;;  %vm149_vm10 = vweird.f32 %v734_v11 }
  0xdd   :  { %vm150_vm12 = vmor %vm148_vm11, %vm149_vm10 }
  0xde   :  { %v144_v13 = vmul.f32 %v734_v11, %v143_v12 }
  0xe0   :  { %v145_v14 = vmul.f32 0.5, %v144_v13 }
  0xe2   :  { %v146_v15 = vsub.f32 1.5, %v145_v14 }
  0xe4   :  { %v147_v16 = vmul.f32 %v734_v11, %v146_v15 }
  0xe6   :  { %v151_v17 = vsel %vm150_vm12, %v734_v11, %v147_v16  ;;  %v706_v11 = vld [vmem:[#allocation2 + $0x60] sm:$0xff]  ;;  %v705_v16 = vld [vmem:[#allocation2 + $0x58] sm:$0xff] }
  0xe7   :  { %v152_v18 = vmul.f32 %v151_v17, %v840_v4  ;;  %400 = vmatpush.bf16.msra.mxu2 %v706_v11 }
  0xe9   :  { %v153_v19 = vmul.f32 %v152_v18, %v128_v55  ;;  %v158_v21 = vperm.slane %v152_v18, 1 }
  0xeb   :  { %v155_v20 = vrot.slane %v153_v19, 7  ;;  %v159_v23 = vmul.f32 %v158_v21, %v112_v39  ;;  %v160_v24 = vmul.f32 %v158_v21, %v113_v40  ;;  %401 = vmatpush.bf16.msra.mxu2 %v705_v16  ;;  %v704_v19 = vld [vmem:[#allocation2 + $0x50] sm:$0xff] }
  0xed   :  { %v157_v22 = vsub.f32 %v840_v4, %v155_v20 }
  0xef   :  { %v161_v25 = vperm.slane %v157_v22, 2  ;;  %402 = vmatpush.bf16.msra.mxu2 %v704_v19  ;;  %v703_v22 = vld [vmem:[#allocation2 + $0x48] sm:$0xff] }
  0xf1   :  { %v162_v26 = vadd.f32 %v161_v25, %v159_v23  ;;  %v163_v27 = vadd.f32 %v161_v25, %v160_v24  ;;  %v702_v25 = vld [vmem:[#allocation2 + $0x40] sm:$0xff] }
  0xf3   :  { %v164_v28 = vpack.c.bf16 %v163_v27, %v162_v26  ;;  %403 = vmatpush.bf16.msra.mxu2 %v703_v22 }
  0xf5   :  { %239 = vmatmul.bf16.vlgmr.msra.gmra.mxu1 %v164_v28 }
  0xf7   :  { %404 = vmatpush.bf16.msra.mxu2 %v702_v25 }
 0x172   :  { %v240_v31 = vpop.f32.mrf.mxu1 }
 0x173   :  { %v241_v32 = vadd.f32 %v240_v31, %v182_v30 }
 0x175   :  { %v624_v33 = vmul.f32 -1.442695, %v241_v32 }
 0x177   :  { %735 = vpow2.f32 %v624_v33 }
 0x17a   :  { %v242_v34 = vpop.f32.mrf.mxu1 }
 0x17b   :  { %v243_v4 = vadd.f32 %v242_v34, %v182_v30 }
 0x17d   :  { %v736_v35 = vpop.eup %735  ;;  %v625_v36 = vmul.f32 -1.442695, %v243_v4 }
 0x17e   :  { %v251_v37 = vadd.f32 1.0, %v736_v35 }
 0x17f   :  { %737 = vpow2.f32 %v625_v36 }
 0x180   :  { %739 = vrcp.f32 %v251_v37  ;;  %v264_v47 = vand.u32 2147483648, %v251_v37  ;;  %vm258_vm14 = vweird.f32 %v251_v37  ;;  %v262_v48 = vand.u32 2147483647, %v251_v37 }
 0x182   :  { %v265_v55 = vor.u32 1.1754944e-38, %v264_v47  ;;  %vm263_vm1 = vcmp.eq.f32.partialorder %v262_v48, 8.507059e+37  ;;  %v862_v47 = vld [vmem:[%s906_s4 + $0x4] sm:$0x7] }
 0x183   :  { %v348_v48 = vperm.slane %v862_v47, 0 }
 0x185   :  { %v738_v38 = vpop.eup %737 }
 0x186   :  { %v740_v39 = vpop.eup %739  ;;  %v252_v40 = vadd.f32 1.0, %v738_v38 }
 0x187   :  { %v254_v41 = vmul.f32 %v740_v39, %v251_v37  ;;  %vm259_vm13 = vweird.f32 %v740_v39 }
 0x188   :  { %741 = vrcp.f32 %v252_v40  ;;  %vm260_vm15 = vmor %vm258_vm14, %vm259_vm13  ;;  %v279_v50 = vand.u32 2147483648, %v252_v40  ;;  %v277_v54 = vand.u32 2147483647, %v252_v40  ;;  %vm273_vm2 = vweird.f32 %v252_v40 }
 0x189   :  { %v255_v42 = vsub.f32 1.0, %v254_v41 }
 0x18a   :  { %v280_v58 = vor.u32 1.1754944e-38, %v279_v50  ;;  %vm278_vm4 = vcmp.eq.f32.partialorder %v277_v54, 8.507059e+37 }
 0x18b   :  { %v256_v43 = vmul.f32 %v740_v39, %v255_v42 }
 0x18d   :  { %v257_v45 = vadd.f32 %v740_v39, %v256_v43 }
 0x18e   :  { %v742_v44 = vpop.eup %741 }
 0x18f   :  { %v269_v46 = vmul.f32 %v742_v44, %v252_v40  ;;  %v261_v51 = vsel %vm260_vm15, %v740_v39, %v257_v45  ;;  %vm274_vm0 = vweird.f32 %v742_v44 }
 0x190   :  { %v266_v57 = vsel %vm263_vm1, %v265_v55, %v261_v51  ;;  %vm275_vm3 = vmor %vm273_vm2, %vm274_vm0 }
 0x191   :  { %v270_v49 = vsub.f32 1.0, %v269_v46  ;;  %v283_v61 = vmul.f32 %v266_v57, %v241_v32 }
 0x193   :  { %v271_v53 = vmul.f32 %v742_v44, %v270_v49 }
 0x195   :  { %v272_v56 = vadd.f32 %v742_v44, %v271_v53 }
 0x197   :  { %v276_v59 = vsel %vm275_vm3, %v742_v44, %v272_v56  ;;  %vm577_vm3 = vcmask 64512  }
 0x198   :  { %v281_v60 = vsel %vm278_vm4, %v280_v58, %v276_v59 }
 0x199   :  { %v284_v62 = vmul.f32 %v281_v60, %v243_v4 }
 0x19b   :  { %v285_v63 = vadd.f32 %v284_v62, %v283_v61 }
 0x19d   :  { %v286_v0 = vrot.slane %v285_v63, 4 }
 0x19f   :  { %v287_v1 = vadd.f32 %v286_v0, %v285_v63 }
 0x1a1   :  { %v288_v3 = vrot.slane %v287_v1, 2 }
 0x1a3   :  { %v289_v6 = vadd.f32 %v288_v3, %v287_v1 }
 0x1a5   :  { %v290_v7 = vrot.slane %v289_v6, 1 }
 0x1a7   :  { %v291_v9 = vadd.f32 %v290_v7, %v289_v6 }
 0x1a9   :  { %v292_v10 = vmul.f32 %v291_v9, %v843_v52 }
 0x1ab   :  { %v293_v12 = vsub.f32 %v283_v61, %v292_v10  ;;  %v294_v13 = vsub.f32 %v284_v62, %v292_v10 }
 0x1ad   :  { %v295_v14 = vmul.f32 %v293_v12, %v293_v12  ;;  %v296_v15 = vmul.f32 %v294_v13, %v294_v13 }
 0x1af   :  { %v297_v17 = vadd.f32 %v296_v15, %v295_v14 }
 0x1b1   :  { %v298_v18 = vrot.slane %v297_v17, 4 }
 0x1b3   :  { %v299_v20 = vadd.f32 %v298_v18, %v297_v17 }
 0x1b5   :  { %v300_v21 = vrot.slane %v299_v20, 2 }
 0x1b7   :  { %v301_v23 = vadd.f32 %v300_v21, %v299_v20  ;;  %v717_v21 = vld [vmem:[%s907_s5 + $0x38] sm:$0xff] }
 0x1b8   :  { %563 = vmatpush.bf16.msra.mxu3 %v717_v21 }
 0x1b9   :  { %v302_v24 = vrot.slane %v301_v23, 1 }
 0x1bb   :  { %v303_v26 = vadd.f32 %v302_v24, %v301_v23  ;;  %v716_v23 = vld [vmem:[%s907_s5 + $0x30] sm:$0xff] }
 0x1bc   :  { %564 = vmatpush.bf16.msra.mxu3 %v716_v23 }
 0x1bd   :  { %v304_v27 = vmul.f32 %v303_v26, %v843_v52  ;;  %v715_v26 = vld [vmem:[%s907_s5 + $0x28] sm:$0xff] }
 0x1bf   :  { %v305_v28 = vadd.f32 1e-05, %v304_v27 }
 0x1c0   :  { %565 = vmatpush.bf16.msra.mxu3 %v715_v26 }
 0x1c1   :  { %743 = vrsqrt.f32 %v305_v28  ;;  %vm312_vm6 = vweird.f32 %v305_v28 }
 0x1c7   :  { %v744_v30 = vpop.eup %743 }
 0x1c8   :  { %v307_v31 = vmul.f32 %v744_v30, %v305_v28  ;;  %vm313_vm5 = vweird.f32 %v744_v30 }
 0x1c9   :  { %vm314_vm7 = vmor %vm312_vm6, %vm313_vm5 }
 0x1ca   :  { %v308_v32 = vmul.f32 %v744_v30, %v307_v31 }
 0x1cc   :  { %v309_v33 = vmul.f32 0.5, %v308_v32 }
 0x1ce   :  { %v310_v34 = vsub.f32 1.5, %v309_v33 }
 0x1d0   :  { %v311_v4 = vmul.f32 %v744_v30, %v310_v34 }
 0x1d2   :  { %v315_v35 = vsel %vm314_vm7, %v744_v30, %v311_v4  ;;  %v714_v30 = vld [vmem:[%s907_s5 + $0x20] sm:$0xff]  ;;  %v713_v4 = vld [vmem:[%s907_s5 + $0x18] sm:$0xff] }
 0x1d3   :  { %v316_v36 = vmul.f32 %v315_v35, %v852_v29  ;;  %566 = vmatpush.bf16.msra.mxu3 %v714_v30 }
 0x1d5   :  { %v317_v37 = vmul.f32 %v316_v36, %v292_v10  ;;  %v322_v39 = vperm.slane %v316_v36, 1 }
 0x1d7   :  { %v319_v38 = vrot.slane %v317_v37, 7  ;;  %v323_v41 = vmul.f32 %v322_v39, %v283_v61  ;;  %v324_v42 = vmul.f32 %v322_v39, %v284_v62  ;;  %567 = vmatpush.bf16.msra.mxu3 %v713_v4  ;;  %v712_v37 = vld [vmem:[%s907_s5 + $0x10] sm:$0xff] }
 0x1d9   :  { %v321_v40 = vsub.f32 %v852_v29, %v319_v38 }
 0x1db   :  { %v325_v43 = vperm.slane %v321_v40, 2  ;;  %568 = vmatpush.bf16.msra.mxu3 %v712_v37  ;;  %v711_v40 = vld [vmem:[%s907_s5 + $0x8] sm:$0xff] }
 0x1dd   :  { %v326_v44 = vadd.f32 %v325_v43, %v323_v41  ;;  %v327_v45 = vadd.f32 %v325_v43, %v324_v42  ;;  %v710_v43 = vld [vmem:[%s907_s5] sm:$0xff] }
 0x1df   :  { %v328_v46 = vpack.c.bf16 %v327_v45, %v326_v44  ;;  %569 = vmatpush.bf16.msra.mxu3 %v711_v40 }
 0x1e1   :  { %405 = vmatmul.bf16.vlgmr.msra.gmra.mxu2 %v328_v46 }
 0x1e3   :  { %570 = vmatpush.bf16.msra.mxu3 %v710_v43 }
 0x264   :  { %v406_v49 = vpop.f32.mrf.mxu2 }
 0x265   :  { %v407_v50 = vadd.f32 %v406_v49, %v348_v48 }
 0x267   :  { %v659_v51 = vmul.f32 -1.442695, %v407_v50 }
 0x269   :  { %745 = vpow2.f32 %v659_v51 }
 0x26c   :  { %v408_v53 = vpop.f32.mrf.mxu2 }
 0x26d   :  { %v409_v29 = vadd.f32 %v408_v53, %v348_v48 }
 0x26f   :  { %v746_v54 = vpop.eup %745  ;;  %v660_v55 = vmul.f32 -1.442695, %v409_v29 }
 0x270   :  { %v417_v56 = vadd.f32 1.0, %v746_v54 }
 0x271   :  { %747 = vpow2.f32 %v660_v55 }
 0x272   :  { %749 = vrcp.f32 %v417_v56  ;;  %v430_v2 = vand.u32 2147483648, %v417_v56  ;;  %vm424_vm9 = vweird.f32 %v417_v56  ;;  %v428_v3 = vand.u32 2147483647, %v417_v56 }
 0x274   :  { %v431_v10 = vor.u32 1.1754944e-38, %v430_v2  ;;  %vm429_vm12 = vcmp.eq.f32.partialorder %v428_v3, 8.507059e+37 }
 0x277   :  { %v748_v57 = vpop.eup %747 }
 0x278   :  { %v750_v58 = vpop.eup %749  ;;  %v418_v59 = vadd.f32 1.0, %v748_v57 }
 0x279   :  { %v420_v60 = vmul.f32 %v750_v58, %v417_v56  ;;  %vm425_vm8 = vweird.f32 %v750_v58 }
 0x27a   :  { %751 = vrcp.f32 %v418_v59  ;;  %vm426_vm10 = vmor %vm424_vm9, %vm425_vm8  ;;  %v445_v6 = vand.u32 2147483648, %v418_v59  ;;  %v443_v9 = vand.u32 2147483647, %v418_v59  ;;  %vm439_vm13 = vweird.f32 %v418_v59 }
 0x27b   :  { %v421_v61 = vsub.f32 1.0, %v420_v60 }
 0x27c   :  { %v446_v13 = vor.u32 1.1754944e-38, %v445_v6  ;;  %vm444_vm15 = vcmp.eq.f32.partialorder %v443_v9, 8.507059e+37 }
 0x27d   :  { %v422_v62 = vmul.f32 %v750_v58, %v421_v61 }
 0x27f   :  { %v423_v0 = vadd.f32 %v750_v58, %v422_v62 }
 0x280   :  { %v752_v63 = vpop.eup %751 }
 0x281   :  { %v435_v1 = vmul.f32 %v752_v63, %v418_v59  ;;  %v427_v7 = vsel %vm426_vm10, %v750_v58, %v423_v0  ;;  %vm440_vm11 = vweird.f32 %v752_v63 }
 0x282   :  { %v432_v12 = vsel %vm429_vm12, %v431_v10, %v427_v7  ;;  %vm441_vm14 = vmor %vm439_vm13, %vm440_vm11 }
 0x283   :  { %v436_v5 = vsub.f32 1.0, %v435_v1  ;;  %v449_v16 = vmul.f32 %v432_v12, %v407_v50  ;;  %v722_v1 = vld [vmem:[%s908_s6] ss:$0 sm:$0xff] }
 0x285   :  { %v437_v8 = vmul.f32 %v752_v63, %v436_v5 }
 0x287   :  { %v438_v11 = vadd.f32 %v752_v63, %v437_v8 }
 0x289   :  { %v442_v14 = vsel %vm441_vm14, %v752_v63, %v438_v11 }
 0x28a   :  { %v447_v15 = vsel %vm444_vm15, %v446_v13, %v442_v14 }
 0x28b   :  { %v450_v17 = vmul.f32 %v447_v15, %v409_v29 }
 0x28d   :  { %v451_v18 = vadd.f32 %v450_v17, %v449_v16 }
 0x28f   :  { %v452_v19 = vrot.slane %v451_v18, 4 }
 0x291   :  { %v453_v20 = vadd.f32 %v452_v19, %v451_v18 }
 0x293   :  { %v454_v22 = vrot.slane %v453_v20, 2 }
 0x295   :  { %v455_v24 = vadd.f32 %v454_v22, %v453_v20 }
 0x297   :  { %v456_v25 = vrot.slane %v455_v24, 1 }
 0x299   :  { %v457_v27 = vadd.f32 %v456_v25, %v455_v24 }
 0x29b   :  { %v458_v28 = vmul.f32 %v457_v27, %v843_v52 }
 0x29d   :  { %v459_v31 = vsub.f32 %v449_v16, %v458_v28  ;;  %v460_v32 = vsub.f32 %v450_v17, %v458_v28 }
 0x29f   :  { %v461_v33 = vmul.f32 %v459_v31, %v459_v31  ;;  %v462_v34 = vmul.f32 %v460_v32, %v460_v32 }
 0x2a1   :  { %v463_v35 = vadd.f32 %v462_v34, %v461_v33 }
 0x2a3   :  { %v464_v36 = vrot.slane %v463_v35, 4 }
 0x2a5   :  { %v465_v38 = vadd.f32 %v464_v36, %v463_v35 }
 0x2a7   :  { %v466_v39 = vrot.slane %v465_v38, 2 }
 0x2a9   :  { %v467_v41 = vadd.f32 %v466_v39, %v465_v38 }
 0x2ab   :  { %v468_v42 = vrot.slane %v467_v41, 1 }
 0x2ad   :  { %v469_v44 = vadd.f32 %v468_v42, %v467_v41 }
 0x2af   :  { %v470_v45 = vmul.f32 %v469_v44, %v843_v52 }
 0x2b1   :  { %v471_v46 = vadd.f32 1e-05, %v470_v45 }
 0x2b3   :  { %753 = vrsqrt.f32 %v471_v46  ;;  %vm478_vm1 = vweird.f32 %v471_v46 }
 0x2b9   :  { %v754_v48 = vpop.eup %753 }
 0x2ba   :  { %v473_v49 = vmul.f32 %v754_v48, %v471_v46  ;;  %vm479_vm0 = vweird.f32 %v754_v48 }
 0x2bb   :  { %vm480_vm2 = vmor %vm478_vm1, %vm479_vm0 }
 0x2bc   :  { %v474_v50 = vmul.f32 %v754_v48, %v473_v49 }
 0x2be   :  { %v475_v51 = vmul.f32 0.5, %v474_v50 }
 0x2c0   :  { %v476_v53 = vsub.f32 1.5, %v475_v51 }
 0x2c2   :  { %v477_v29 = vmul.f32 %v754_v48, %v476_v53 }
 0x2c4   :  { %v481_v54 = vsel %vm480_vm2, %v754_v48, %v477_v29 }
 0x2c5   :  { %v482_v55 = vmul.f32 %v862_v47, %v481_v54 }
 0x2c7   :  { %v483_v56 = vmul.f32 %v482_v55, %v458_v28  ;;  %v488_v58 = vperm.slane %v482_v55, 1 }
 0x2c9   :  { %v485_v57 = vrot.slane %v483_v56, 7  ;;  %v489_v59 = vmul.f32 %v488_v58, %v449_v16  ;;  %v490_v60 = vmul.f32 %v488_v58, %v450_v17 }
 0x2cb   :  { %v487_v52 = vsub.f32 %v862_v47, %v485_v57 }
 0x2cd   :  { %v491_v61 = vperm.slane %v487_v52, 2 }
 0x2cf   :  { %v492_v62 = vadd.f32 %v491_v61, %v489_v59  ;;  %v493_v63 = vadd.f32 %v491_v61, %v490_v60 }
 0x2d1   :  { %v494_v0 = vpack.c.bf16 %v493_v63, %v492_v62 }
 0x2d3   :  { %571 = vmatmul.bf16.vlgmr.msra.gmra.mxu3 %v494_v0 }
 0x356   :  { %v572_v2 = vpop.f32.mrf.mxu3 }
 0x357   :  { %v573_v3 = vadd.f32 %v722_v1, %v572_v2 }
 0x359   :  { %578 = vst.msk [vmem:[%s909_s7] sm:$0xff] %vm577_vm3, %v573_v3 }
 0x35e   :  { %v574_v5 = vpop.f32.mrf.mxu3 }
 0x35f   :  { %v575_v47 = vadd.f32 %v722_v1, %v574_v5 }
 0x361   :  { %579 = vst.msk [vmem:[%s909_s7 + $0x8] sm:$0xff] %vm577_vm3, %v575_v47 }
 0x362   :  { %584 = vsyncpa [#allocation3], 1 }

</bundles_post_ra>
